<compile_context>
chip_gen: v7x
topology: tpu7x:2x2x1
jax: 0.10.0
libtpu: 0.0.40
codegen_flags: <defaults>
</compile_context>

<pallas_src>
import functools
import math

import jax
import jax.numpy as jnp
from jax import lax
from jax.experimental import pallas as pl
from jax.experimental.pallas import tpu as pltpu

_LANE = 128
_SUB = 8
_LANE_CAP = 512                       # 512-class tiles ~ 85% of HBM roofline on v6e
_BLOCK_BUDGET = 4 * 1024 * 1024       # bytes per block; in+out double-buffered <= 16 MiB


def _pack_of(dtype):
    """Sublane packing factor: 1 for 32-bit, 2 for 16-bit, 4 for 8-bit dtypes."""
    return max(1, 4 // dtype.itemsize)


def _lane_tile(dim, cap=_LANE_CAP):
    """Lane-dim tile: a multiple of 128 (or the full dim when it is < 128)."""
    if dim <= _LANE:
        return dim
    return min(cap, (dim // _LANE) * _LANE)


def _halve_lane(t):
    return max(_LANE, (t // 2) // _LANE * _LANE)


def _sublane_small(dim, pack):
    """One native sublane group (dtype-aware), or the full dim if smaller."""
    a = _SUB * pack
    return a if dim >= a else dim


def _sublane_big(dim, pack, cap=_LANE_CAP):
    """Large sublane-aligned tile (multiple of 8*pack, or the full dim if smaller)."""
    a = _SUB * pack
    if dim <= a:
        return dim
    return min(cap, (dim // a) * a)


def _params(grid, blk_bytes):
    # Pipeline VMEM = 2 buffers x (in + out) blocks, plus slack for in-kernel temps.
    # Capped at 48 MiB so it also fits v7x's 64 MiB physical VMEM per TensorCore.
    vmem = int(min(48 << 20, max(32 << 20, 6 * blk_bytes + (8 << 20))))
    return pltpu.CompilerParams(
        dimension_semantics=("parallel",) * len(grid),
        vmem_limit_bytes=vmem)


def _cost(x):
    nbytes = x.size * x.dtype.itemsize
    return pl.CostEstimate(flops=0, transcendentals=0, bytes_accessed=2 * nbytes)


# --------------------------------------------------------------------------
# Kernel 1a: swap of the last two dims of the view (no dims in between).
#   (A, M, N) -> (A, N, M); whole-face 2-D transposes, TA faces per block.
# --------------------------------------------------------------------------
def _minor_b1_kernel(x_ref, o_ref, *, ta):
    # x_ref: (TA, TM, TN)   o_ref: (TA, TN, TM)
    # Per-a slices index only the leading (major) dim -> contiguous faces; each .T is
    # a single batched XLU transpose with dense full-vreg loads/stores.
    for a in range(ta):
        o_ref[a] = x_ref[a].T


def _swap_minor_b1(x3):
    A, M, N = x3.shape
    isz = x3.dtype.itemsize
    TM = _lane_tile(M)
    TN = _lane_tile(N)
    while TM * TN * isz > _BLOCK_BUDGET:
        if TN >= TM and TN > _LANE:        # shrink input lane first; keep the output
            TN = _halve_lane(TN)           # lane dim (TM) wide -> unmasked vst
        elif TM > _LANE:
            TM = _halve_lane(TM)
        else:
            break
    # Batch a few faces per block when the (M, N) face is small, to amortize the
    # ~0.35 us per-grid-step overhead.
    TA = min(A, 8) if TM * TN * isz < (256 << 10) else 1
    grid = (pl.cdiv(A, TA), pl.cdiv(M, TM), pl.cdiv(N, TN))
    blk = TA * TM * TN * isz
    kernel = functools.partial(_minor_b1_kernel, ta=TA)
    return pl.pallas_call(
        kernel,
        out_shape=jax.ShapeDtypeStruct((A, N, M), x3.dtype),
        grid=grid,
        in_specs=[pl.BlockSpec((TA, TM, TN), lambda a, i, j: (a, i, j))],
        out_specs=pl.BlockSpec((TA, TN, TM), lambda a, i, j: (a, j, i)),
        compiler_params=_params(grid, blk),
        cost_estimate=_cost(x3),
    )(x3)


# --------------------------------------------------------------------------
# Kernel 1b: swap involving the last (lane) dim, with dims in between.
#   (A, M, B, N) -> (A, N, B, M); per-b 2-D transpose over one sublane group.
# --------------------------------------------------------------------------
def _minor_kernel(x_ref, o_ref, *, tb):
    # x_ref: (1, TM, TB, TN)   o_ref: (1, TN, TB, TM)
    # TODO(synk): fold into one jnp.swapaxes(x_ref[0], 0, 2) once the Pallas TPU
    # transpose lowering accepts non-minor permutations; today only batched
    # last-two-dim transposes lower, so TB is kept to one (dtype-aware) sublane group.
    for b in range(tb):
        o_ref[0, :, b, :] = x_ref[0, :, b, :].T


def _swap_minor(x4):
    A, M, B, N = x4.shape
    isz = x4.dtype.itemsize
    pack = _pack_of(x4.dtype)
    TB = _sublane_small(B, pack)
    TM = _lane_tile(M)
    TN = _lane_tile(N)
    while TM * TB * TN * isz > _BLOCK_BUDGET:
        if TN >= TM and TN > _LANE:
            TN = _halve_lane(TN)
        elif TM > _LANE:
            TM = _halve_lane(TM)
        else:
            break
    grid = (A, pl.cdiv(B, TB), pl.cdiv(M, TM), pl.cdiv(N, TN))
    blk = TM * TB * TN * isz
    kernel = functools.partial(_minor_kernel, tb=TB)
    return pl.pallas_call(
        kernel,
        out_shape=jax.ShapeDtypeStruct((A, N, B, M), x4.dtype),
        grid=grid,
        in_specs=[pl.BlockSpec((1, TM, TB, TN), lambda a, b, i, j: (a, i, b, j))],
        out_specs=pl.BlockSpec((1, TN, TB, TM), lambda a, b, i, j: (a, j, b, i)),
        compiler_params=_params(grid, blk),
        cost_estimate=_cost(x4),
    )(x4)


# --------------------------------------------------------------------------
# Kernel 2: swap of two non-minor dims (lane dim untouched).
#   (A, M, B, N, C) -> (A, N, B, M, C); strided (TM, TC) loads, dense stores.
# --------------------------------------------------------------------------
def _major_kernel(x_ref, o_ref, *, tn):
    # x_ref: (1, TM, 1, TN, TC)   o_ref: (1, TN, 1, TM, TC)
    # TODO(synk): replace with one jnp.swapaxes over (TM, TN, TC) once Mosaic lowers
    # non-minor vector transposes; stores stay lane-dense (TM, TC) slabs meanwhile.
    for n in range(tn):
        o_ref[0, n, 0, :, :] = x_ref[0, :, 0, n, :]


def _swap_major(x5):
    A, M, B, N, C = x5.shape
    isz = x5.dtype.itemsize
    pack = _pack_of(x5.dtype)
    align = _SUB * pack
    TN = _sublane_small(N, pack)       # unrolled loop length (8/16/32 or full N)
    TC = _lane_tile(C)                 # lane dim, kept dense
    TM = _sublane_big(M, pack)         # sublane dim of the (dense) output stores
    while TM * TN * TC * isz > _BLOCK_BUDGET and TM > align:
        TM = max(align, (TM // 2) // align * align)
    grid = (A, B, pl.cdiv(M, TM), pl.cdiv(N, TN), pl.cdiv(C, TC))
    blk = TM * TN * TC * isz
    kernel = functools.partial(_major_kernel, tn=TN)
    return pl.pallas_call(
        kernel,
        out_shape=jax.ShapeDtypeStruct((A, N, B, M, C), x5.dtype),
        grid=grid,
        in_specs=[pl.BlockSpec((1, TM, 1, TN, TC),
                               lambda a, b, i, j, c: (a, i, b, j, c))],
        out_specs=pl.BlockSpec((1, TN, 1, TM, TC),
                               lambda a, b, i, j, c: (a, j, b, i, c)),
        compiler_params=_params(grid, blk),
        cost_estimate=_cost(x5),
    )(x5)


# --------------------------------------------------------------------------
# Sub-32-bit lane packing for the major path (the lane dim is untouched by the swap,
# so adjacent lane elements can be reinterpreted as one 32-bit word).
# --------------------------------------------------------------------------
def _pack_lanes(x5):
    dt = x5.dtype
    isz = dt.itemsize
    if isz >= 4 or dt.kind == 'b':
        return None
    g = 4 // isz
    A, M, B, N, C = x5.shape
    if C % g != 0:
        return None
    x6 = x5.reshape(A, M, B, N, C // g, g)
    return lax.bitcast_convert_type(x6, jnp.uint32), g


def _unpack_lanes(y5, dtype, g):
    A, N, B, M, Cg = y5.shape
    y6 = lax.bitcast_convert_type(y5, dtype)       # (A, N, B, M, Cg, g)
    return y6.reshape(A, N, B, M, Cg * g)


# --------------------------------------------------------------------------
# Public wrapper: x.transpose(dim1, dim2)
# --------------------------------------------------------------------------
def pallas_transpose(x, dim1, dim2):
    nd = x.ndim
    d1, d2 = sorted((dim1 % nd, dim2 % nd))
    if d1 == d2:
        return x                                   # degenerate swap: no data movement
    if x.size == 0:
        return jnp.swapaxes(x, d1, d2)             # nothing to move
    shape = x.shape
    A = math.prod(shape[:d1])
    M = shape[d1]
    B = math.prod(shape[d1 + 1:d2])
    N = shape[d2]
    C = math.prod(shape[d2 + 1:])
    out_shape = list(shape)
    out_shape[d1], out_shape[d2] = out_shape[d2], out_shape[d1]

    if C == 1:                                     # swap touches the last dim
        if B == 1:
            y = _swap_minor_b1(x.reshape(A, M, N))
        else:
            y = _swap_minor(x.reshape(A, M, B, N))
    else:                                          # last dim(s) untouched
        x5 = x.reshape(A, M, B, N, C)
        packed = _pack_lanes(x5)
        if packed is not None:
            x5p, g = packed
            y = _unpack_lanes(_swap_major(x5p), x.dtype, g)
        else:
            y = _swap_major(x5)
    return y.reshape(out_shape)


class Trans:
    """Mirror of the PyTorch `trans` module."""

    def __init__(self, dim1, dim2):
        self.dim1, self.dim2 = dim1, dim2

    def __call__(self, x):
        return pallas_transpose(x, self.dim1, self.dim2)


# --------------------------------------------------------------------------
if __name__ == "__main__":
    key = jax.random.PRNGKey(0)
    x = jax.random.normal(key, (2, 4, 16, 16), jnp.float32)

    # Representative (dim1, dim2) pairs covering all kernel paths.
    cases = [(2, 3), (1, 2), (1, 3), (0, 2), (-1, -2)]
    for d1, d2 in cases:
        fwd = jax.jit(functools.partial(pallas_transpose, dim1=d1, dim2=d2))
        out = jax.block_until_ready(fwd(x))
        ref = jnp.swapaxes(x, d1, d2)
        assert out.shape == ref.shape, (d1, d2, out.shape, ref.shape)
        assert bool(jnp.array_equal(out, ref)), (
            d1, d2, float(jnp.max(jnp.abs(out - ref))))

    # bf16 exercises the uint32 lane-packing path on the major swap.
    xb = x.astype(jnp.bfloat16)
    outb = jax.block_until_ready(
        jax.jit(functools.partial(pallas_transpose, dim1=1, dim2=2))(xb))
    assert bool(jnp.array_equal(outb, jnp.swapaxes(xb, 1, 2)))

    # Non-128-divisible dims exercise cdiv-padded edge blocks (no full-dim fallback).
    xl = jax.random.normal(jax.random.PRNGKey(1), (2, 4, 160, 144), jnp.float32)
    outl = jax.block_until_ready(
        jax.jit(functools.partial(pallas_transpose, dim1=2, dim2=3))(xl))
    assert bool(jnp.array_equal(outl, jnp.swapaxes(xl, 2, 3)))

    print("KERNEL_OK")
</pallas_src>

<mosaic_0001>
module attributes {stable_mosaic.version = 11 : i64} {
  func.func @_minor_b1_kernel(%arg0: i32, %arg1: i32, %arg2: i32, %arg3: memref<8x16x16xf32, #tpu.memory_space<vmem>>, %arg4: memref<8x16x16xf32, #tpu.memory_space<vmem>>) attributes {dimension_semantics = [#tpu.dimension_semantics<parallel>, #tpu.dimension_semantics<parallel>, #tpu.dimension_semantics<parallel>], iteration_bounds = array<i64: 1, 1, 1>, scalar_prefetch = 0 : i64, scratch_operands = 0 : i64, tpu.core_type = #tpu.core_type<tc>, window_params = [{transform_indices = @transform_0, window_bounds = array<i64: 8, 16, 16>}, {transform_indices = @transform_1, window_bounds = array<i64: 8, 16, 16>}]} {
    %c0 = arith.constant 0 : index
    %c0_0 = arith.constant 0 : index
    %c0_1 = arith.constant 0 : index
    %0 = vector.load %arg3[%c0, %c0_0, %c0_1] : memref<8x16x16xf32, #tpu.memory_space<vmem>>, vector<1x16x16xf32>
    %1 = vector.shape_cast %0 : vector<1x16x16xf32> to vector<16x16xf32>
    %2 = tpu.transpose %1, [1, 0] : vector<16x16xf32> -> vector<16x16xf32>
    %c0_2 = arith.constant 0 : index
    %c0_3 = arith.constant 0 : index
    %c0_4 = arith.constant 0 : index
    %3 = vector.load %arg4[%c0_2, %c0_3, %c0_4] : memref<8x16x16xf32, #tpu.memory_space<vmem>>, vector<1x16x16xf32>
    %4 = vector.shape_cast %3 : vector<1x16x16xf32> to vector<16x16xf32>
    %5 = vector.shape_cast %2 : vector<16x16xf32> to vector<1x16x16xf32>
    tpu.vector_store %arg4[%c0_2, %c0_3, %c0_4], %5 {strides = array<i32>} : memref<8x16x16xf32, #tpu.memory_space<vmem>>, vector<1x16x16xf32>,
    %c1 = arith.constant 1 : index
    %c0_5 = arith.constant 0 : index
    %c0_6 = arith.constant 0 : index
    %6 = vector.load %arg3[%c1, %c0_5, %c0_6] : memref<8x16x16xf32, #tpu.memory_space<vmem>>, vector<1x16x16xf32>
    %7 = vector.shape_cast %6 : vector<1x16x16xf32> to vector<16x16xf32>
    %8 = tpu.transpose %7, [1, 0] : vector<16x16xf32> -> vector<16x16xf32>
    %c1_7 = arith.constant 1 : index
    %c0_8 = arith.constant 0 : index
    %c0_9 = arith.constant 0 : index
    %9 = vector.load %arg4[%c1_7, %c0_8, %c0_9] : memref<8x16x16xf32, #tpu.memory_space<vmem>>, vector<1x16x16xf32>
    %10 = vector.shape_cast %9 : vector<1x16x16xf32> to vector<16x16xf32>
    %11 = vector.shape_cast %8 : vector<16x16xf32> to vector<1x16x16xf32>
    tpu.vector_store %arg4[%c1_7, %c0_8, %c0_9], %11 {strides = array<i32>} : memref<8x16x16xf32, #tpu.memory_space<vmem>>, vector<1x16x16xf32>,
    %c2 = arith.constant 2 : index
    %c0_10 = arith.constant 0 : index
    %c0_11 = arith.constant 0 : index
    %12 = vector.load %arg3[%c2, %c0_10, %c0_11] : memref<8x16x16xf32, #tpu.memory_space<vmem>>, vector<1x16x16xf32>
    %13 = vector.shape_cast %12 : vector<1x16x16xf32> to vector<16x16xf32>
    %14 = tpu.transpose %13, [1, 0] : vector<16x16xf32> -> vector<16x16xf32>
    %c2_12 = arith.constant 2 : index
    %c0_13 = arith.constant 0 : index
    %c0_14 = arith.constant 0 : index
    %15 = vector.load %arg4[%c2_12, %c0_13, %c0_14] : memref<8x16x16xf32, #tpu.memory_space<vmem>>, vector<1x16x16xf32>
    %16 = vector.shape_cast %15 : vector<1x16x16xf32> to vector<16x16xf32>
    %17 = vector.shape_cast %14 : vector<16x16xf32> to vector<1x16x16xf32>
    tpu.vector_store %arg4[%c2_12, %c0_13, %c0_14], %17 {strides = array<i32>} : memref<8x16x16xf32, #tpu.memory_space<vmem>>, vector<1x16x16xf32>,
    %c3 = arith.constant 3 : index
    %c0_15 = arith.constant 0 : index
    %c0_16 = arith.constant 0 : index
    %18 = vector.load %arg3[%c3, %c0_15, %c0_16] : memref<8x16x16xf32, #tpu.memory_space<vmem>>, vector<1x16x16xf32>
    %19 = vector.shape_cast %18 : vector<1x16x16xf32> to vector<16x16xf32>
    %20 = tpu.transpose %19, [1, 0] : vector<16x16xf32> -> vector<16x16xf32>
    %c3_17 = arith.constant 3 : index
    %c0_18 = arith.constant 0 : index
    %c0_19 = arith.constant 0 : index
    %21 = vector.load %arg4[%c3_17, %c0_18, %c0_19] : memref<8x16x16xf32, #tpu.memory_space<vmem>>, vector<1x16x16xf32>
    %22 = vector.shape_cast %21 : vector<1x16x16xf32> to vector<16x16xf32>
    %23 = vector.shape_cast %20 : vector<16x16xf32> to vector<1x16x16xf32>
    tpu.vector_store %arg4[%c3_17, %c0_18, %c0_19], %23 {strides = array<i32>} : memref<8x16x16xf32, #tpu.memory_space<vmem>>, vector<1x16x16xf32>,
    %c4 = arith.constant 4 : index
    %c0_20 = arith.constant 0 : index
    %c0_21 = arith.constant 0 : index
    %24 = vector.load %arg3[%c4, %c0_20, %c0_21] : memref<8x16x16xf32, #tpu.memory_space<vmem>>, vector<1x16x16xf32>
    %25 = vector.shape_cast %24 : vector<1x16x16xf32> to vector<16x16xf32>
    %26 = tpu.transpose %25, [1, 0] : vector<16x16xf32> -> vector<16x16xf32>
    %c4_22 = arith.constant 4 : index
    %c0_23 = arith.constant 0 : index
    %c0_24 = arith.constant 0 : index
    %27 = vector.load %arg4[%c4_22, %c0_23, %c0_24] : memref<8x16x16xf32, #tpu.memory_space<vmem>>, vector<1x16x16xf32>
    %28 = vector.shape_cast %27 : vector<1x16x16xf32> to vector<16x16xf32>
    %29 = vector.shape_cast %26 : vector<16x16xf32> to vector<1x16x16xf32>
    tpu.vector_store %arg4[%c4_22, %c0_23, %c0_24], %29 {strides = array<i32>} : memref<8x16x16xf32, #tpu.memory_space<vmem>>, vector<1x16x16xf32>,
    %c5 = arith.constant 5 : index
    %c0_25 = arith.constant 0 : index
    %c0_26 = arith.constant 0 : index
    %30 = vector.load %arg3[%c5, %c0_25, %c0_26] : memref<8x16x16xf32, #tpu.memory_space<vmem>>, vector<1x16x16xf32>
    %31 = vector.shape_cast %30 : vector<1x16x16xf32> to vector<16x16xf32>
    %32 = tpu.transpose %31, [1, 0] : vector<16x16xf32> -> vector<16x16xf32>
    %c5_27 = arith.constant 5 : index
    %c0_28 = arith.constant 0 : index
    %c0_29 = arith.constant 0 : index
    %33 = vector.load %arg4[%c5_27, %c0_28, %c0_29] : memref<8x16x16xf32, #tpu.memory_space<vmem>>, vector<1x16x16xf32>
    %34 = vector.shape_cast %33 : vector<1x16x16xf32> to vector<16x16xf32>
    %35 = vector.shape_cast %32 : vector<16x16xf32> to vector<1x16x16xf32>
    tpu.vector_store %arg4[%c5_27, %c0_28, %c0_29], %35 {strides = array<i32>} : memref<8x16x16xf32, #tpu.memory_space<vmem>>, vector<1x16x16xf32>,
    %c6 = arith.constant 6 : index
    %c0_30 = arith.constant 0 : index
    %c0_31 = arith.constant 0 : index
    %36 = vector.load %arg3[%c6, %c0_30, %c0_31] : memref<8x16x16xf32, #tpu.memory_space<vmem>>, vector<1x16x16xf32>
    %37 = vector.shape_cast %36 : vector<1x16x16xf32> to vector<16x16xf32>
    %38 = tpu.transpose %37, [1, 0] : vector<16x16xf32> -> vector<16x16xf32>
    %c6_32 = arith.constant 6 : index
    %c0_33 = arith.constant 0 : index
    %c0_34 = arith.constant 0 : index
    %39 = vector.load %arg4[%c6_32, %c0_33, %c0_34] : memref<8x16x16xf32, #tpu.memory_space<vmem>>, vector<1x16x16xf32>
    %40 = vector.shape_cast %39 : vector<1x16x16xf32> to vector<16x16xf32>
    %41 = vector.shape_cast %38 : vector<16x16xf32> to vector<1x16x16xf32>
    tpu.vector_store %arg4[%c6_32, %c0_33, %c0_34], %41 {strides = array<i32>} : memref<8x16x16xf32, #tpu.memory_space<vmem>>, vector<1x16x16xf32>,
    %c7 = arith.constant 7 : index
    %c0_35 = arith.constant 0 : index
    %c0_36 = arith.constant 0 : index
    %42 = vector.load %arg3[%c7, %c0_35, %c0_36] : memref<8x16x16xf32, #tpu.memory_space<vmem>>, vector<1x16x16xf32>
    %43 = vector.shape_cast %42 : vector<1x16x16xf32> to vector<16x16xf32>
    %44 = tpu.transpose %43, [1, 0] : vector<16x16xf32> -> vector<16x16xf32>
    %c7_37 = arith.constant 7 : index
    %c0_38 = arith.constant 0 : index
    %c0_39 = arith.constant 0 : index
    %45 = vector.load %arg4[%c7_37, %c0_38, %c0_39] : memref<8x16x16xf32, #tpu.memory_space<vmem>>, vector<1x16x16xf32>
    %46 = vector.shape_cast %45 : vector<1x16x16xf32> to vector<16x16xf32>
    %47 = vector.shape_cast %44 : vector<16x16xf32> to vector<1x16x16xf32>
    tpu.vector_store %arg4[%c7_37, %c0_38, %c0_39], %47 {strides = array<i32>} : memref<8x16x16xf32, #tpu.memory_space<vmem>>, vector<1x16x16xf32>,
    return
  }
  func.func @transform_0(%arg0: i32, %arg1: i32, %arg2: i32) -> (i32, i32, i32) {
    %c0_i32 = arith.constant 0 : i32
    return %arg0, %arg1, %arg2 : i32, i32, i32
  }
  func.func @transform_1(%arg0: i32, %arg1: i32, %arg2: i32) -> (i32, i32, i32) {
    %c0_i32 = arith.constant 0 : i32
    return %arg0, %arg2, %arg1 : i32, i32, i32
  }
}

</mosaic_0001>

<bundles_post_ra>
// kernel: pallas_transpose.1
= control target key start
LH: loop header
LB: loop body
LE: loop exit
PB: predicated region body
PF: predicated region fallthrough
CT: control target
= control target key end

     0   :  { %6 = vsyncpa [#allocation3], 0  ;;  %s456_s0 = inlined_call_operand.hbm [shape: f32[8,16,16], index: 0, kind: input, shape index: {}]   ;;  %s457_s1 = inlined_call_operand.hbm [shape: f32[8,16,16], index: 1, kind: output, shape index: {}]  }
   0x1   :  { %7 = vsyncpa [#allocation4], 0  ;;  %s396_s6 = smov [#allocation2]   ;;  %s348_s10 = scalar_lea.hbm %s456_s0, 2048 }
   0x2   :  { %s13_s7 = sshll.u32 %s396_s6, 4  ;;  %p349_p0 = scmp.ne.s32.totalorder %s456_s0, %s348_s10  ;;  %s14_s7 = int_to_ptr.vmem [resolvable:$true] %s13_s7 }
   0x3   :  { %p352_p1 = scmp.lt.u32.totalorder %s348_s10, %s456_s0 }
   0x5   :  { %p354_p2 = pnand %p352_p1, %p349_p0 }
   0x7   :  { %357 = shalt.err (!%p354_p2)
}
   0x8   :  { %s358_s15 = scalar_lea.vmem %s14_s7, 2048  ;;  %p363_p4 = scmp.lt.s32.totalorder %s14_s7, %s14_s7 }
   0x9   :  { %p359_p3 = scmp.ne.s32.totalorder %s14_s7, %s358_s15  ;;  %p364_p5 = scmp.lt.s32.totalorder %s358_s15, %s358_s15 }
   0xb   :  { %p365_p6 = por %p364_p5, %p363_p4 }
   0xd   :  { %p366_p7 = pnand %p365_p6, %p359_p3 }
   0xf   :  { %369 = shalt.err (!%p366_p7)
}
  0x10   :  { %s397_s16 = smov 128   ;;  %s398_s17 = smov 8  }
  0x11   :  { %19 = dma.hbm_to_vmem [thread:$0]  %s456_s0, 2048, %s14_s7, [#allocation3], %s397_s16, %s397_s16, %s398_s17  }
  0x12   :  { %392 = dma.done.wait [#allocation3], 2048  }
  0x13   :  { %393 = vsyncadd [#allocation3], 4294965248  ;;  %v61_v0 = vld [vmem:[#allocation2 + $0x10] sm:$0xff]  ;;  %v23_v1 = vld [vmem:[#allocation2] sm:$0xff]  ;;  %vm57_vm0 = vcmask 130048   ;;  %s399_s0 = smov [#allocation5]  }
  0x14   :  { %63 = vxpose.xlu1.b32.start [1/2] (short) (narrow) %v61_v0, 16  ;;  %25 = vxpose.xlu0.b32.start [1/2] (short) (narrow) %v23_v1, 16  ;;  %v62_v2 = vld [vmem:[#allocation2 + $0x18] sm:$0xff]  ;;  %v24_v3 = vld [vmem:[#allocation2 + $0x8] sm:$0xff]  ;;  %v137_v4 = vld [vmem:[#allocation2 + $0x30] sm:$0xff]  ;;  %s331_s20 = sshll.u32 %s399_s0, 4  ;;  %s332_s20 = int_to_ptr.vmem [resolvable:$true] %s331_s20 }
  0x15   :  { %v99_v5 = vld [vmem:[#allocation2 + $0x20] sm:$0xff]  ;;  %v138_v6 = vld [vmem:[#allocation2 + $0x38] sm:$0xff]  ;;  %v100_v7 = vld [vmem:[#allocation2 + $0x28] sm:$0xff]  ;;  %s370_s21 = scalar_lea.vmem %s332_s20, 2048  ;;  %p375_p9 = scmp.lt.s32.totalorder %s332_s20, %s332_s20 }
  0x16   :  { %v213_v8 = vld [vmem:[#allocation2 + $0x50] sm:$0xff]  ;;  %v175_v9 = vld [vmem:[#allocation2 + $0x40] sm:$0xff]  ;;  %v214_v10 = vld [vmem:[#allocation2 + $0x58] sm:$0xff]  ;;  %p371_p8 = scmp.ne.s32.totalorder %s332_s20, %s370_s21  ;;  %p376_p10 = scmp.lt.s32.totalorder %s370_s21, %s370_s21 }
  0x17   :  { %v176_v11 = vld [vmem:[#allocation2 + $0x48] sm:$0xff]  ;;  %v289_v12 = vld [vmem:[#allocation2 + $0x70] sm:$0xff]  ;;  %v251_v13 = vld [vmem:[#allocation2 + $0x60] sm:$0xff] }
  0x18   :  { %64 = vxpose.xlu1.b32.end [2/2] (short) (narrow) %v62_v2, 16  ;;  %26 = vxpose.xlu0.b32.end [2/2] (short) (narrow) %v24_v3, 16  ;;  %v290_v14 = vld [vmem:[#allocation2 + $0x78] sm:$0xff]  ;;  %v252_v15 = vld [vmem:[#allocation2 + $0x68] sm:$0xff]  ;;  %p377_p11 = por %p376_p10, %p375_p9 }
  0x1a   :  { %p378_p12 = pnand %p377_p11, %p371_p8 }
  0x1c   :  { %139 = vxpose.xlu1.b32.start [1/2] (short) (narrow) %v137_v4, 16  ;;  %101 = vxpose.xlu0.b32.start [1/2] (short) (narrow) %v99_v5, 16 }
  0x20   :  { %140 = vxpose.xlu1.b32.end [2/2] (short) (narrow) %v138_v6, 16  ;;  %102 = vxpose.xlu0.b32.end [2/2] (short) (narrow) %v100_v7, 16 }
  0x24   :  { %215 = vxpose.xlu1.b32.start [1/2] (short) (narrow) %v213_v8, 16  ;;  %177 = vxpose.xlu0.b32.start [1/2] (short) (narrow) %v175_v9, 16 }
  0x28   :  { %216 = vxpose.xlu1.b32.end [2/2] (short) (narrow) %v214_v10, 16  ;;  %178 = vxpose.xlu0.b32.end [2/2] (short) (narrow) %v176_v11, 16 }
  0x2c   :  { %291 = vxpose.xlu1.b32.start [1/2] (short) (narrow) %v289_v12, 16  ;;  %253 = vxpose.xlu0.b32.start [1/2] (short) (narrow) %v251_v13, 16 }
  0x30   :  { %292 = vxpose.xlu1.b32.end [2/2] (short) (narrow) %v290_v14, 16  ;;  %254 = vxpose.xlu0.b32.end [2/2] (short) (narrow) %v252_v15, 16 }
  0x94   :  { %v79_v16 = vpop.trf.xlu1  ;;  %v41_v17 = vpop.trf.xlu0 }
  0x95   :  { %96 = vst.msk [vmem:[#allocation5 + $0x10] sm:$0xff] %vm57_vm0, %v79_v16  ;;  %58 = vst.msk [vmem:[#allocation5] sm:$0xff] %vm57_vm0, %v41_v17 }
  0x98   :  { %v80_v18 = vpop.trf.xlu1  ;;  %v42_v19 = vpop.trf.xlu0 }
  0x99   :  { %97 = vst.msk [vmem:[#allocation5 + $0x18] sm:$0xff] %vm57_vm0, %v80_v18  ;;  %59 = vst.msk [vmem:[#allocation5 + $0x8] sm:$0xff] %vm57_vm0, %v42_v19 }
  0x9c   :  { %v155_v20 = vpop.trf.xlu1  ;;  %v117_v21 = vpop.trf.xlu0 }
  0x9d   :  { %172 = vst.msk [vmem:[#allocation5 + $0x30] sm:$0xff] %vm57_vm0, %v155_v20  ;;  %134 = vst.msk [vmem:[#allocation5 + $0x20] sm:$0xff] %vm57_vm0, %v117_v21 }
  0xa0   :  { %v156_v22 = vpop.trf.xlu1  ;;  %v118_v23 = vpop.trf.xlu0 }
  0xa1   :  { %173 = vst.msk [vmem:[#allocation5 + $0x38] sm:$0xff] %vm57_vm0, %v156_v22  ;;  %135 = vst.msk [vmem:[#allocation5 + $0x28] sm:$0xff] %vm57_vm0, %v118_v23 }
  0xa4   :  { %v231_v24 = vpop.trf.xlu1  ;;  %v193_v25 = vpop.trf.xlu0 }
  0xa5   :  { %248 = vst.msk [vmem:[#allocation5 + $0x50] sm:$0xff] %vm57_vm0, %v231_v24  ;;  %210 = vst.msk [vmem:[#allocation5 + $0x40] sm:$0xff] %vm57_vm0, %v193_v25 }
  0xa8   :  { %v232_v26 = vpop.trf.xlu1  ;;  %v194_v27 = vpop.trf.xlu0 }
  0xa9   :  { %249 = vst.msk [vmem:[#allocation5 + $0x58] sm:$0xff] %vm57_vm0, %v232_v26  ;;  %211 = vst.msk [vmem:[#allocation5 + $0x48] sm:$0xff] %vm57_vm0, %v194_v27 }
  0xac   :  { %v307_v28 = vpop.trf.xlu1  ;;  %v269_v29 = vpop.trf.xlu0 }
  0xad   :  { %324 = vst.msk [vmem:[#allocation5 + $0x70] sm:$0xff] %vm57_vm0, %v307_v28  ;;  %286 = vst.msk [vmem:[#allocation5 + $0x60] sm:$0xff] %vm57_vm0, %v269_v29 }
  0xb0   :  { %v308_v30 = vpop.trf.xlu1  ;;  %v270_v31 = vpop.trf.xlu0 }
  0xb1   :  { %325 = vst.msk [vmem:[#allocation5 + $0x78] sm:$0xff] %vm57_vm0, %v308_v30  ;;  %287 = vst.msk [vmem:[#allocation5 + $0x68] sm:$0xff] %vm57_vm0, %v270_v31 }
  0xb2   :  { %381 = shalt.err (!%p378_p12)
}
  0xb3   :  { %s382_s24 = scalar_lea.hbm %s457_s1, 2048 }
  0xb4   :  { %p383_p13 = scmp.ne.s32.totalorder %s457_s1, %s382_s24  ;;  %p386_p0 = scmp.lt.u32.totalorder %s382_s24, %s457_s1 }
  0xb6   :  { %p388_p1 = pnand %p386_p0, %p383_p13 }
  0xb8   :  { %391 = shalt.err (!%p388_p1)
}
  0xb9   :  { %337 = dma.vmem_to_hbm [thread:$0]  %s332_s20, 2048, %s457_s1, [#allocation4], %s397_s16, %s397_s16, %s398_s17  }
  0xba   :  { %394 = dma.done.wait [#allocation4], 2048  }
  0xbb   :  { %395 = vsyncadd [#allocation4], 4294965248 }
  0xbc   :  { %341 = vsyncpa [#allocation3], 1 }
  0xbd   :  { %342 = vsyncpa [#allocation4], 1 }

</bundles_post_ra>
